<compile_context>
chip_gen: v5e
topology: v5e:2x2
jax: 0.10.0
libtpu: 0.0.40
codegen_flags: <defaults>
</compile_context>

<pallas_src>
import functools

import jax
import jax.numpy as jnp
from jax.experimental import pallas as pl
from jax.experimental.pallas import tpu as pltpu

NEG_SLOPE = 0.01      # torch.nn.LeakyReLU default negative_slope
LANE = 128            # TPU lane width
SUBLANE_BF16 = 16     # native bf16 sublane tile -> minimum row-tile granularity


def _round_up(x, m):
    return ((x + m - 1) // m) * m


def _pick_lane_width():
    """128 lanes on v5e and older (128x128 MXUs); 256 on v6e/v7x (256x256 MXU)."""
    try:
        kind = jax.devices()[0].device_kind.lower()
    except Exception:
        return LANE
    if any(g in kind for g in ("v2", "v3", "v4", "v5")):
        return LANE
    return 2 * LANE


def _pick_tile_m(folded_counts, *, min_tile=SUBLANE_BF16, max_tile=1024,
                 target_tiles=8):
    """Adaptive folded-row tile: small for tiny inputs, up to 1024 for large
    ones, keeping >= target_tiles grid steps so megacore + pipelining have work."""
    total = sum(_round_up(max(c, 1), min_tile) for c in folded_counts)
    tile = min_tile
    while tile * 2 <= max_tile and total // (tile * 2) >= target_tiles:
        tile *= 2
    return tile


def _hetero_mlp_kernel(tid_ref, x_ref, w1_ref, b1_ref, w2_ref, b2_ref, o_ref):
    """Fused 2-layer MLP on one folded row tile.

    Stacked weights/biases are VMEM-resident (constant index_map); the node
    type for this tile is read from the scalar-prefetched id table and the
    matching block-diagonal weight slice is selected in-kernel.
    """
    t = tid_ref[pl.program_id(0)]
    x = x_ref[...]                                              # bf16 [tm, d_pad]
    h = jnp.dot(x, w1_ref[t], preferred_element_type=jnp.float32) + b1_ref[t]
    h = jnp.maximum(h, NEG_SLOPE * h)                           # LeakyReLU in f32
    y = jnp.dot(h.astype(w2_ref.dtype), w2_ref[t],
                preferred_element_type=jnp.float32) + b2_ref[t]
    o_ref[...] = y.astype(o_ref.dtype)


@functools.partial(jax.jit, static_argnames=("tile_m",))
def _fused_hetero_mlp(tile_type_ids, x_all, w1s, b1s, w2s, b2s, *, tile_m):
    """One pallas_call over all node types.

    tile_type_ids : int32 [num_tiles]           per-row-tile node-type index
    x_all         : bf16  [total_rows, d_pad]   folded, row-concatenated inputs
    w1s, w2s      : bf16  [T, d_pad, d_pad]     block-diagonal folded weights
    b1s, b2s      : f32   [T, 1, d_pad]         lane-tiled biases
    """
    total, d_pad = x_all.shape
    num_tiles = total // tile_m
    n_types = w1s.shape[0]

    return pl.pallas_call(
        _hetero_mlp_kernel,
        out_shape=jax.ShapeDtypeStruct((total, d_pad), x_all.dtype),
        grid_spec=pltpu.PrefetchScalarGridSpec(
            num_scalar_prefetch=1,
            grid=(num_tiles,),
            in_specs=[
                # activations: lane-dense folded row tile
                pl.BlockSpec((tile_m, d_pad), lambda i, tid: (i, 0)),
                # stacked weights/biases: constant index_map -> copied once and
                # kept VMEM-resident across all grid steps.
                pl.BlockSpec((n_types, d_pad, d_pad), lambda i, tid: (0, 0, 0)),
                pl.BlockSpec((n_types, 1, d_pad), lambda i, tid: (0, 0, 0)),
                pl.BlockSpec((n_types, d_pad, d_pad), lambda i, tid: (0, 0, 0)),
                pl.BlockSpec((n_types, 1, d_pad), lambda i, tid: (0, 0, 0)),
            ],
            out_specs=pl.BlockSpec((tile_m, d_pad), lambda i, tid: (i, 0)),
        ),
        compiler_params=pltpu.CompilerParams(
            dimension_semantics=("parallel",),
        ),
    )(tile_type_ids, x_all, w1s, b1s, w2s, b2s)


def hetero_mlp_forward(params, x_dict, *, lane_width=None, tile_m=None):
    """hetero_MLP.forward: apply each node type's MLP, fused into one kernel."""
    node_types = list(params.keys())
    p0 = params[node_types[0]]
    in_dim, hidden = p0["w1"].shape
    out_dim = p0["w2"].shape[1]
    # post_mlp config: in_dim == hidden == out_dim (== hidden_channels).
    assert in_dim == hidden == out_dim, "fold-into-lanes path expects equal dims"
    d = in_dim

    if lane_width is None:
        lane_width = _pick_lane_width()
    fold = lane_width // d if (d <= lane_width and lane_width % d == 0) else 1
    d_pad = lane_width if fold > 1 else _round_up(d, LANE)

    if tile_m is None:
        tile_m = _pick_tile_m([-(-x_dict[nt].shape[0] // fold)
                               for nt in node_types])

    # --- stack per-type weights as fold-x block-diagonal bf16 [T, d_pad, d_pad]
    eye = jnp.eye(fold, dtype=jnp.float32)

    def fold_wb(w, b):
        wf = jnp.kron(eye, w) if fold > 1 else w
        bf = jnp.tile(b, (1, fold)) if fold > 1 else b
        wf = jnp.pad(wf, ((0, d_pad - wf.shape[0]), (0, d_pad - wf.shape[1])))
        bf = jnp.pad(bf, ((0, 0), (0, d_pad - bf.shape[1])))
        return wf, bf

    w1s, b1s, w2s, b2s = [], [], [], []
    for nt in node_types:
        p = params[nt]
        wf1, bf1 = fold_wb(p["w1"], p["b1"])
        wf2, bf2 = fold_wb(p["w2"], p["b2"])
        w1s.append(wf1); b1s.append(bf1); w2s.append(wf2); b2s.append(bf2)
    w1s = jnp.stack(w1s).astype(jnp.bfloat16)
    w2s = jnp.stack(w2s).astype(jnp.bfloat16)
    b1s = jnp.stack(b1s).astype(jnp.float32)   # added after f32 accumulate
    b2s = jnp.stack(b2s).astype(jnp.float32)

    # --- fold + concatenate activations; each type padded to whole row tiles so
    #     every grid step sees exactly one node type.
    x_blocks, tile_ids, spans = [], [], []
    off = 0
    for t, nt in enumerate(node_types):
        assert nt in x_dict
        x = x_dict[nt]
        n = x.shape[0]
        rows_f = -(-n // fold)                       # folded rows needed
        rows_pad = _round_up(max(rows_f, 1), tile_m)
        if fold > 1:
            n_pad = rows_pad * fold
            xp = jnp.pad(x, ((0, n_pad - n), (0, 0))).reshape(rows_pad, d_pad)
        else:
            xp = jnp.pad(x, ((0, rows_pad - n), (0, d_pad - d)))
        x_blocks.append(xp.astype(jnp.bfloat16))
        tile_ids.extend([t] * (rows_pad // tile_m))
        spans.append((off, rows_pad, n))
        off += rows_pad
    x_all = jnp.concatenate(x_blocks, axis=0)
    tile_type_ids = jnp.asarray(tile_ids, dtype=jnp.int32)

    out_all = _fused_hetero_mlp(tile_type_ids, x_all, w1s, b1s, w2s, b2s,
                                tile_m=tile_m)

    # --- un-fold the padded slab back into the per-type dict.
    out = {}
    for nt, (o, rows_pad, n) in zip(node_types, spans):
        blk = out_all[o:o + rows_pad]
        if fold > 1:
            blk = blk.reshape(rows_pad * fold, d)
        out[nt] = blk[:n, :out_dim].astype(jnp.float32)
    return out


def _init_linear(key, in_dim, out_dim):
    """PyTorch-Linear-style init: U(-1/sqrt(fan_in), 1/sqrt(fan_in)).

    Weight stored pre-transposed as [in_dim, out_dim]; bias is [1, out_dim].
    """
    kw, kb = jax.random.split(key)
    bound = 1.0 / jnp.sqrt(jnp.float32(in_dim))
    w = jax.random.uniform(kw, (in_dim, out_dim), jnp.float32, -bound, bound)
    b = jax.random.uniform(kb, (1, out_dim), jnp.float32, -bound, bound)
    return w, b


def init_hetero_mlp_params(key, node_types, in_dim, hidden_dim, out_dim):
    params = {}
    for i, nt in enumerate(node_types):
        k1, k2 = jax.random.split(jax.random.fold_in(key, i))
        w1, b1 = _init_linear(k1, in_dim, hidden_dim)
        w2, b2 = _init_linear(k2, hidden_dim, out_dim)
        params[nt] = dict(w1=w1, b1=b1, w2=w2, b2=b2)
    return params


def _reference_forward(params, x_dict):
    """Plain-JAX reference emulating the kernel's bf16-input / f32-accum math."""
    out = {}
    for key, p in params.items():
        xb = x_dict[key].astype(jnp.bfloat16)
        w1 = p["w1"].astype(jnp.bfloat16)
        w2 = p["w2"].astype(jnp.bfloat16)
        h = jnp.dot(xb, w1, preferred_element_type=jnp.float32) + p["b1"]
        h = jnp.maximum(h, NEG_SLOPE * h)
        y = jnp.dot(h.astype(jnp.bfloat16), w2,
                    preferred_element_type=jnp.float32) + p["b2"]
        out[key] = y.astype(jnp.bfloat16).astype(jnp.float32)
    return out


if __name__ == "__main__":
    key = jax.random.PRNGKey(0)

    # model_params for the post_mlp variant
    hidden_channels = 32
    in_dim = hidden_channels            # post_mlp: in_dim = hidden_channels
    out_dim = hidden_channels
    node_types = ("author", "paper")

    # per-node-type feature matrices [N_nodes, in_dim]
    kx1, kx2, kp = jax.random.split(key, 3)
    x_dict = {
        "author": jax.random.normal(kx1, (16, in_dim), jnp.float32),
        "paper": jax.random.normal(kx2, (8, in_dim), jnp.float32),
    }

    params = init_hetero_mlp_params(kp, node_types, in_dim, hidden_channels,
                                    out_dim)

    out_dict = hetero_mlp_forward(params, x_dict)
    for v in out_dict.values():
        jax.block_until_ready(v)

    # sanity check vs. plain-JAX reference (bf16 inputs, f32 accumulate)
    ref = _reference_forward(params, x_dict)
    for k in node_types:
        assert out_dict[k].shape == (x_dict[k].shape[0], out_dim)
        assert jnp.allclose(out_dict[k], ref[k], atol=2e-2, rtol=2e-2), k

    print("KERNEL_OK")
</pallas_src>

<mosaic_0001>
module attributes {stable_mosaic.version = 11 : i64} {
  func.func @_hetero_mlp_kernel(%arg0: i32, %arg1: memref<2xi32, #tpu.memory_space<smem>>, %arg2: memref<16x256xbf16, #tpu.memory_space<vmem>>, %arg3: memref<2x256x256xbf16, #tpu.memory_space<vmem>>, %arg4: memref<2x1x256xf32, #tpu.memory_space<vmem>>, %arg5: memref<2x256x256xbf16, #tpu.memory_space<vmem>>, %arg6: memref<2x1x256xf32, #tpu.memory_space<vmem>>, %arg7: memref<16x256xbf16, #tpu.memory_space<vmem>>) attributes {dimension_semantics = [#tpu.dimension_semantics<parallel>], iteration_bounds = array<i64: 2>, scalar_prefetch = 1 : i64, scratch_operands = 0 : i64, tpu.core_type = #tpu.core_type<tc>, window_params = [{transform_indices = @transform_0, window_bounds = array<i64: 16, 256>}, {pipeline_mode = #tpu.pipeline_mode<synchronous>, transform_indices = @transform_1, window_bounds = array<i64: 2, 256, 256>}, {pipeline_mode = #tpu.pipeline_mode<synchronous>, transform_indices = @transform_2, window_bounds = array<i64: 2, 1, 256>}, {pipeline_mode = #tpu.pipeline_mode<synchronous>, transform_indices = @transform_3, window_bounds = array<i64: 2, 256, 256>}, {pipeline_mode = #tpu.pipeline_mode<synchronous>, transform_indices = @transform_4, window_bounds = array<i64: 2, 1, 256>}, {transform_indices = @transform_5, window_bounds = array<i64: 16, 256>}]} {
    %0 = arith.index_cast %arg0 : i32 to index
    %1 = memref.load %arg1[%0] : memref<2xi32, #tpu.memory_space<smem>>
    %c0 = arith.constant 0 : index
    %c0_0 = arith.constant 0 : index
    %2 = vector.load %arg2[%c0, %c0_0] : memref<16x256xbf16, #tpu.memory_space<vmem>>, vector<16x256xbf16>
    %3 = arith.index_cast %1 : i32 to index
    %c0_1 = arith.constant 0 : index
    %c0_2 = arith.constant 0 : index
    %4 = vector.load %arg3[%3, %c0_1, %c0_2] : memref<2x256x256xbf16, #tpu.memory_space<vmem>>, vector<1x256x256xbf16>
    %5 = vector.shape_cast %4 : vector<1x256x256xbf16> to vector<256x256xbf16>
    %cst = arith.constant dense<0.000000e+00> : vector<16x256xf32>
    %6 = tpu.matmul %2, %5, %cst {dimension_numbers = #tpu.dot_dimension_numbers<[1], [0], [0], [1], [0, 0, 1, 1], [], []>} : vector<16x256xbf16>, vector<256x256xbf16>, vector<16x256xf32> -> vector<16x256xf32>
    %7 = arith.index_cast %1 : i32 to index
    %c0_3 = arith.constant 0 : index
    %c0_4 = arith.constant 0 : index
    %8 = vector.load %arg4[%7, %c0_3, %c0_4] : memref<2x1x256xf32, #tpu.memory_space<vmem>>, vector<1x1x256xf32>
    %9 = vector.shape_cast %8 : vector<1x1x256xf32> to vector<1x256xf32>
    %10 = vector.broadcast %9 : vector<1x256xf32> to vector<16x256xf32>
    %11 = arith.addf %6, %10 : vector<16x256xf32>
    %cst_5 = arith.constant 0.00999999977 : f32
    %12 = vector.broadcast %cst_5 : f32 to vector<16x256xf32>
    %13 = arith.mulf %12, %11 : vector<16x256xf32>
    %14 = arith.maximumf %11, %13 : vector<16x256xf32>
    %15 = arith.truncf %14 : vector<16x256xf32> to vector<16x256xbf16>
    %16 = arith.index_cast %1 : i32 to index
    %c0_6 = arith.constant 0 : index
    %c0_7 = arith.constant 0 : index
    %17 = vector.load %arg5[%16, %c0_6, %c0_7] : memref<2x256x256xbf16, #tpu.memory_space<vmem>>, vector<1x256x256xbf16>
    %18 = vector.shape_cast %17 : vector<1x256x256xbf16> to vector<256x256xbf16>
    %cst_8 = arith.constant dense<0.000000e+00> : vector<16x256xf32>
    %19 = tpu.matmul %15, %18, %cst_8 {dimension_numbers = #tpu.dot_dimension_numbers<[1], [0], [0], [1], [0, 0, 1, 1], [], []>} : vector<16x256xbf16>, vector<256x256xbf16>, vector<16x256xf32> -> vector<16x256xf32>
    %20 = arith.index_cast %1 : i32 to index
    %c0_9 = arith.constant 0 : index
    %c0_10 = arith.constant 0 : index
    %21 = vector.load %arg6[%20, %c0_9, %c0_10] : memref<2x1x256xf32, #tpu.memory_space<vmem>>, vector<1x1x256xf32>
    %22 = vector.shape_cast %21 : vector<1x1x256xf32> to vector<1x256xf32>
    %23 = vector.broadcast %22 : vector<1x256xf32> to vector<16x256xf32>
    %24 = arith.addf %19, %23 : vector<16x256xf32>
    %25 = arith.truncf %24 : vector<16x256xf32> to vector<16x256xbf16>
    %c0_11 = arith.constant 0 : index
    %c0_12 = arith.constant 0 : index
    %26 = vector.load %arg7[%c0_11, %c0_12] : memref<16x256xbf16, #tpu.memory_space<vmem>>, vector<16x256xbf16>
    tpu.vector_store %arg7[%c0_11, %c0_12], %25 {strides = array<i32>} : memref<16x256xbf16, #tpu.memory_space<vmem>>, vector<16x256xbf16>,
    return
  }
  func.func @transform_0(%arg0: i32, %arg1: memref<2xi32, #tpu.memory_space<smem>>) -> (i32, i32) {
    %c0_i32 = arith.constant 0 : i32
    %c0_i32_0 = arith.constant 0 : i32
    return %arg0, %c0_i32 : i32, i32
  }
  func.func @transform_1(%arg0: i32, %arg1: memref<2xi32, #tpu.memory_space<smem>>) -> (i32, i32, i32) {
    %c0_i32 = arith.constant 0 : i32
    %c0_i32_0 = arith.constant 0 : i32
    %c0_i32_1 = arith.constant 0 : i32
    %c0_i32_2 = arith.constant 0 : i32
    return %c0_i32, %c0_i32_0, %c0_i32_1 : i32, i32, i32
  }
  func.func @transform_2(%arg0: i32, %arg1: memref<2xi32, #tpu.memory_space<smem>>) -> (i32, i32, i32) {
    %c0_i32 = arith.constant 0 : i32
    %c0_i32_0 = arith.constant 0 : i32
    %c0_i32_1 = arith.constant 0 : i32
    %c0_i32_2 = arith.constant 0 : i32
    return %c0_i32, %c0_i32_0, %c0_i32_1 : i32, i32, i32
  }
  func.func @transform_3(%arg0: i32, %arg1: memref<2xi32, #tpu.memory_space<smem>>) -> (i32, i32, i32) {
    %c0_i32 = arith.constant 0 : i32
    %c0_i32_0 = arith.constant 0 : i32
    %c0_i32_1 = arith.constant 0 : i32
    %c0_i32_2 = arith.constant 0 : i32
    return %c0_i32, %c0_i32_0, %c0_i32_1 : i32, i32, i32
  }
  func.func @transform_4(%arg0: i32, %arg1: memref<2xi32, #tpu.memory_space<smem>>) -> (i32, i32, i32) {
    %c0_i32 = arith.constant 0 : i32
    %c0_i32_0 = arith.constant 0 : i32
    %c0_i32_1 = arith.constant 0 : i32
    %c0_i32_2 = arith.constant 0 : i32
    return %c0_i32, %c0_i32_0, %c0_i32_1 : i32, i32, i32
  }
  func.func @transform_5(%arg0: i32, %arg1: memref<2xi32, #tpu.memory_space<smem>>) -> (i32, i32) {
    %c0_i32 = arith.constant 0 : i32
    %c0_i32_0 = arith.constant 0 : i32
    return %arg0, %c0_i32 : i32, i32
  }
}

</mosaic_0001>

<bundles_post_ra>
// kernel: _fused_hetero_mlp.1
= control target key start
LH: loop header
LB: loop body
LE: loop exit
PB: predicated region body
PF: predicated region fallthrough
CT: control target
= control target key end

     0   :  { %s1633_s24 = smov [#allocation3]   ;;  %s2006_s0 = inlined_call_operand.hbm [shape: s32[2], index: 0, kind: input, shape index: {}]   ;;  %s2007_s1 = inlined_call_operand.hbm [shape: bf16[32,256], index: 1, kind: input, shape index: {}]   ;;  %s2008_s2 = inlined_call_operand.hbm [shape: bf16[2,256,256], index: 2, kind: input, shape index: {}]   ;;  %s2009_s3 = inlined_call_operand.hbm [shape: f32[2,1,256], index: 3, kind: input, shape index: {}]   ;;  %s2010_s4 = inlined_call_operand.hbm [shape: bf16[2,256,256], index: 4, kind: input, shape index: {}]   ;;  %s2011_s5 = inlined_call_operand.vmem [shape: f32[2,1,256], index: 5, kind: input, shape index: {}]   ;;  %s2012_s6 = inlined_call_operand.hbm [shape: bf16[32,256], index: 6, kind: output, shape index: {}]  }
   0x1   :  { %s12_s23 = sshll.u32 %s2006_s0, 4  ;;  %s13_s23 = int_to_ptr.hbm [resolvable:$true] %s12_s23 }
   0x2   :  { %15 = dma.hbm_to_smem %s13_s23, 16, %s1633_s24, [#allocation2] }
   0x3   :  { %1599 = dma.done.wait [#allocation2], 16 }
   0x4   :  { %1600 = vsyncadd [#allocation2], 4294967280 }
   0x5   :  { %18 = sfence }
   0x6   :  { %19 = vsyncpa [#allocation5], 0 }
   0x7   :  { %21 = vsyncpa [#allocation5 + $0x1], 0 }
   0x8   :  { %22 = vsyncpa [#allocation8], 0 }
   0x9   :  { %23 = vsyncpa [#allocation11], 0 }
   0xa   :  { %24 = vsyncpa [#allocation6], 0 }
   0xb   :  { %26 = vsyncpa [#allocation6 + $0x1], 0  ;;  %s1681_s25 = smov 0   ;;  %s1683_s26 = smov 0  }
   0xc   :  { %s1685_s27 = smov 0   ;;  %s1687_s28 = smov 0  }
   0xd LB: > { %s1702_s0 = sadd.s32 4294967295, %s1631_s28   ;;  %s977_s29 = sadd.s32 4294967294, %s1631_s28   ;;  %s1631_s28 = sphi %s1687_s28, %s2025_s28   ;;  %s1627_s27 = sphi %s1685_s27, %s2024_s27   ;;  %s1623_s26 = sphi %s1683_s26, %s2023_s26   ;;  %s1619_s25 = sphi %s1681_s25, %s2022_s25  }
   0xe   : > { %p52_p0 = scmp.ne.s32.totalorder %s1623_s26, %s1619_s25  ;;  %p53_p1 = scmp.eq.s32.totalorder %s1702_s0, 0 }
   0xf   : > { %p160_p2 = scmp.eq.s32.totalorder %s1702_s0, 1  ;;  %p166_p3 = scmp.eq.s32.totalorder %s977_s29, 1 }
  0x10   : > { %p1711_p4 = por %p53_p1, %p52_p0  ;;  %p978_p5 = scmp.ge.s32.totalorder %s1631_s28, 1 }
  0x11   : > { %p1716_p6 = por %p166_p3, %p52_p0  ;;  %p173_p7 = scmp.lt.s32.totalorder %s1631_s28, 3 }
  0x12   : > { %s184_s10 = sshll.u32 %s2008_s2, 4  ;;  %s1634_s12 = smov [#allocation7]   ;;  %s185_s10 = int_to_ptr.hbm [resolvable:$true] %s184_s10 }
  0x13   : > { %p1724_p8 = pnand %p978_p5, %p173_p7  ;;  %s186_s13 = sshll.u32 %s1634_s12, 4  ;;  %s187_s13 = int_to_ptr.vmem [resolvable:$true] %s186_s13 }
  0x14   : > { %s198_s17 = sshll.u32 %s2009_s3, 4  ;;  %s2013_s18 = smov 128   ;;  %s199_s17 = int_to_ptr.hbm [resolvable:$true] %s198_s17 }
  0x15   : > { %p1355_p9 = pneg %p1724_p8  ;;  %s1636_s19 = smov 8  }
  0x16   : > { %s1637_s20 = smov [#allocation9]   ;;  %s1638_s22 = smov 32  }
  0x17   : > { %p1732_p10 = pnand %p1355_p9, %p53_p1  ;;  %s200_s21 = sshll.u32 %s1637_s20, 4  ;;  %s201_s21 = int_to_ptr.vmem [resolvable:$true] %s200_s21 }
  0x18   : > { %s1639_s23 = smov 2   ;;  %s212_s8 = sshll.u32 %s2010_s4, 4  ;;  %s213_s8 = int_to_ptr.hbm [resolvable:$true] %s212_s8 }
  0x19   : > { %1358 = dma.hbm_to_vmem [thread:$0]  (!%p1732_p10), %s185_s10, 8192, %s187_s13, [#allocation8], %s2013_s18, %s2013_s18, %s1636_s19  }
  0x1a   : > { %1361 = dma.hbm_to_vmem [thread:$0]  (!%p1732_p10), %s199_s17, 64, %s201_s21, [#allocation8], %s1638_s22, %s1638_s22, %s1639_s23  }
  0x1b   : > { %s1640_s9 = smov [#allocation10]   ;;  %s1756_s12 = sadd.s32 1, %s1631_s28  }
  0x1c   : > { %s214_s10 = sshll.u32 %s1640_s9, 4  ;;  %s36_s13 = ssub.s32 %s1631_s28, %s1756_s12  ;;  %s215_s10 = int_to_ptr.vmem [resolvable:$true] %s214_s10 }
  0x1d   : > { %1364 = dma.hbm_to_vmem [thread:$0]  (!%p1732_p10), %s213_s8, 8192, %s215_s10, [#allocation11], %s2013_s18, %s2013_s18, %s1636_s19  }
  0x1e   : > { %s39_s15 = sadd.s32 1, %s1627_s27  ;;  %p37_p12 = scmp.eq.s32.totalorder %s36_s13, 0 }
  0x1f   : > { %p46_p13 = scmp.ne.s32.totalorder %s1627_s27, %s1623_s26  ;;  %p47_p0 = scmp.eq.s32.totalorder %s1631_s28, 0 }
  0x20   : > { %s1765_s16 = scalar_select %p37_p12, %s1627_s27, %s39_s15  }
  0x21   : > { %p1769_p3 = por %p160_p2, %p46_p13  ;;  %p1376_p5 = scmp.lt.s32.totalorder %s1631_s28, 2 }
  0x22   : > { %s231_s14 = sand.u32 1, %s1627_s27   ;;  %s1268_s20 = sshll.u32 %s1631_s28, 4 }
  0x23   : > { %p48_p7 = por %p47_p0, %p46_p13  ;;  %s983_s21 = sshll.u32 %s231_s14, 4 }
  0x24   : > { %s241_s24 = scalar_lea.hbm %s2007_s1, %s1268_s20  ;;  %s235_s8 = scalar_lea.vmem [#allocation4], %s983_s21 }
  0x25   : > { %s242_s29 = sshll.u32 %s241_s24, 4  ;;  %s244_s9 = sshll.u32 %s235_s8, 4  ;;  %s243_s29 = int_to_ptr.hbm [resolvable:$true] %s242_s29  ;;  %s245_s9 = int_to_ptr.vmem [resolvable:$true] %s244_s9 }
  0x26   : > { %p1779_p9 = pnand %p1376_p5, %p48_p7  ;;  %s232_s13 = scalar_lea.sflag [#allocation5], %s231_s14 }
  0x27   : > { %s1525_s15 = sshra.s32 %s243_s29, 4  ;;  %s1532_s21 = scalar_lea.hbm %s2007_s1, 32  ;;  %s1526_s15 = int_to_ptr.hbm [resolvable:$true] %s1525_s15 }
  0x28   : > { %s1527_s18 = scalar_lea.hbm %s1526_s15, 16  ;;  %p1529_p10 = pneg %p1779_p9 }
  0x29   : > { %p1528_p2 = scmp.ne.s32.totalorder %s1526_s15, %s1527_s18  ;;  %p1533_p0 = scmp.lt.s32.totalorder %s1526_s15, %s2007_s1 }
  0x2a   : > { %p1534_p5 = scmp.lt.s32.totalorder %s1532_s21, %s1527_s18 }
  0x2b   : > { %p1530_p12 = pnand %p1529_p10, %p1528_p2 }
  0x2c   : > { %p1535_p7 = por %p1534_p5, %p1533_p0 }
  0x2d   : > { %p1531_p13 = pneg %p1530_p12 }
  0x2f   : > { %p1536_p11 = pnand %p1535_p7, %p1531_p13 }
  0x31   : > { %1539 = shalt.err (!%p1536_p11)
}
  0x32   : > { %s2020_s14 = smov 128   ;;  %256 = sbr.rel (%p1724_p8) target bundleno = 403 (0x193), region = 40 }
  0x33   : > { %1368 = dma.hbm_to_vmem [thread:$0]  (!%p1779_p9), %s243_s29, 256, %s245_s9, %s232_s13, %s2020_s14, %s2020_s14, %s1636_s19  }
  0x34   : > { %s1799_s8 = sand.u32 (!%p1724_p8), 1, %s1623_s26  }
  0x35   : > { %s988_s18 = sshll.u32 (!%p1724_p8), %s1799_s8, 4  ;;  %s259_s15 = scalar_lea.sflag (!%p1724_p8), [#allocation5], %s1799_s8 }
  0x36   : > { %s1805_s20 = scalar_lea.vmem (!%p1724_p8), [#allocation4], %s988_s18 }
  0x37   : > { %1602 = dma.done.wait (%p1711_p4), %s259_s15, 256  }
  0x38   : > { %1604 = vsyncadd (%p1711_p4), %s259_s15, 4294967040 }
  0x39   : > { %1606 = dma.done.wait (%p53_p1), [#allocation8], 8256  }
  0x3a   : > { %1608 = vsyncadd (%p53_p1), [#allocation8], 4294959040 }
  0x3b   : > { %1610 = dma.done.wait (%p53_p1), [#allocation11], 8192  }
  0x3c   : > { %1612 = vsyncadd (%p53_p1), [#allocation11], 4294959104  ;;  %s1820_s11 = sld [smem:[#allocation3 + %s1702_s0]]  ;;  %s1338_s23 = sshll.u32 %s1702_s0, 4 }
  0x3d   : > { %s863_s15 = scalar_lea.hbm %s2012_s6, %s1338_s23  ;;  %s851_s0 = scalar_lea.sflag [#allocation6], %s1799_s8 }
  0x42   : > { %s1271_s19 = sshll.u32 %s1820_s11, 8  ;;  %s995_s9 = sshll.u32 %s1820_s11, 1 }
  0x43   : > { %s1825_s30 = scalar_lea.vmem [#allocation7], %s1271_s19  ;;  %s1894_s29 = scalar_lea.vmem [#allocation10], %s1271_s19 }
  0x44   : > { %v1062_v0 = vld [vmem:[%s1825_s30 + $0x70] sm:$0xf]  ;;  %v1287_v1 = vld [vmem:[%s1825_s30 + $0x74] sm:$0xf0]  ;;  %v1286_v5 = vld [vmem:[%s1825_s30 + $0x74] sm:$0xf]  ;;  %s623_s21 = scalar_lea.vmem %s2011_s5, %s995_s9 }
  0x45   : > { %v1126_v2 = vld [vmem:[%s1825_s30 + $0xf0] sm:$0xf]  ;;  %v1063_v3 = vor.u32 %v1287_v1, %v1062_v0  ;;  %v1303_v4 = vld [vmem:[%s1825_s30 + $0xf4] sm:$0xf0]  ;;  %v1064_v6 = vld [vmem:[%s1825_s30 + $0x78] sm:$0xf0] }
  0x46   : > { %v1127_v7 = vor.u32 %v1303_v4, %v1126_v2  ;;  %v1067_v8 = vor.u32 %v1286_v5, %v1064_v6  ;;  %v1302_v9 = vld [vmem:[%s1825_s30 + $0xf4] sm:$0xf]  ;;  %v1128_v10 = vld [vmem:[%s1825_s30 + $0xf8] sm:$0xf0]  ;;  %v1054_v11 = vld [vmem:[%s1825_s30 + $0x60] sm:$0xf] }
  0x47   : > { %523 = vmatpush.bf16.msra.mxu0 %v1063_v3  ;;  %v1131_v12 = vor.u32 %v1302_v9, %v1128_v10  ;;  %v1285_v13 = vld [vmem:[%s1825_s30 + $0x64] sm:$0xf0]  ;;  %v1118_v14 = vld [vmem:[%s1825_s30 + $0xe0] sm:$0xf]  ;;  %v1284_v18 = vld [vmem:[%s1825_s30 + $0x64] sm:$0xf] }
  0x48   : > { %v1301_v15 = vld [vmem:[%s1825_s30 + $0xe4] sm:$0xf0]  ;;  %537 = vmatpush.bf16.msra.mxu1 %v1127_v7  ;;  %551 = vmatpush.bf16.msra.mxu2 %v1067_v8  ;;  %v1055_v16 = vor.u32 %v1285_v13, %v1054_v11  ;;  %v1056_v19 = vld [vmem:[%s1825_s30 + $0x68] sm:$0xf0]  ;;  %v1300_v20 = vld [vmem:[%s1825_s30 + $0xe4] sm:$0xf] }
  0x49   : > { %v1119_v17 = vor.u32 %v1301_v15, %v1118_v14  ;;  %565 = vmatpush.bf16.msra.mxu3 %v1131_v12  ;;  %v1059_v21 = vor.u32 %v1284_v18, %v1056_v19  ;;  %v1120_v22 = vld [vmem:[%s1825_s30 + $0xe8] sm:$0xf0]  ;;  %v1046_v23 = vld [vmem:[%s1825_s30 + $0x50] sm:$0xf]  ;;  %v1283_v24 = vld [vmem:[%s1825_s30 + $0x54] sm:$0xf0] }
  0x4a   : > { %v1123_v25 = vor.u32 %v1300_v20, %v1120_v22  ;;  %v1110_v26 = vld [vmem:[%s1825_s30 + $0xd0] sm:$0xf]  ;;  %v1299_v27 = vld [vmem:[%s1825_s30 + $0xd4] sm:$0xf0]  ;;  %v1282_v28 = vld [vmem:[%s1825_s30 + $0x54] sm:$0xf]  ;;  %v1047_v29 = vor.u32 %v1283_v24, %v1046_v23 }
  0x4b   : > { %524 = vmatpush.bf16.msra.mxu0 %v1055_v16  ;;  %v1048_v30 = vld [vmem:[%s1825_s30 + $0x58] sm:$0xf0]  ;;  %v1298_v31 = vld [vmem:[%s1825_s30 + $0xd4] sm:$0xf]  ;;  %v1111_v33 = vor.u32 %v1299_v27, %v1110_v26  ;;  %v1038_v35 = vld [vmem:[%s1825_s30 + $0x40] sm:$0xf] }
  0x4c   : > { %v1112_v32 = vld [vmem:[%s1825_s30 + $0xd8] sm:$0xf0]  ;;  %538 = vmatpush.bf16.msra.mxu1 %v1119_v17  ;;  %552 = vmatpush.bf16.msra.mxu2 %v1059_v21  ;;  %v1051_v34 = vor.u32 %v1282_v28, %v1048_v30  ;;  %v1281_v36 = vld [vmem:[%s1825_s30 + $0x44] sm:$0xf0]  ;;  %v1102_v37 = vld [vmem:[%s1825_s30 + $0xc0] sm:$0xf] }
  0x4d   : > { %566 = vmatpush.bf16.msra.mxu3 %v1123_v25  ;;  %v1115_v38 = vor.u32 %v1298_v31, %v1112_v32  ;;  %v1297_v39 = vld [vmem:[%s1825_s30 + $0xc4] sm:$0xf0]  ;;  %v1280_v40 = vld [vmem:[%s1825_s30 + $0x44] sm:$0xf]  ;;  %v1040_v41 = vld [vmem:[%s1825_s30 + $0x48] sm:$0xf0]  ;;  %v1039_v44 = vor.u32 %v1281_v36, %v1038_v35 }
  0x4e   : > { %v1296_v42 = vld [vmem:[%s1825_s30 + $0xc4] sm:$0xf]  ;;  %v1104_v43 = vld [vmem:[%s1825_s30 + $0xc8] sm:$0xf0]  ;;  %v1103_v45 = vor.u32 %v1297_v39, %v1102_v37  ;;  %v1043_v46 = vor.u32 %v1280_v40, %v1040_v41  ;;  %v1030_v47 = vld [vmem:[%s1825_s30 + $0x30] sm:$0xf] }
  0x4f   : > { %525 = vmatpush.bf16.msra.mxu0 %v1047_v29  ;;  %v1279_v48 = vld [vmem:[%s1825_s30 + $0x34] sm:$0xf0]  ;;  %v1094_v49 = vld [vmem:[%s1825_s30 + $0xb0] sm:$0xf]  ;;  %v1107_v50 = vor.u32 %v1296_v42, %v1104_v43  ;;  %v1278_v52 = vld [vmem:[%s1825_s30 + $0x34] sm:$0xf] }
  0x50   : > { %539 = vmatpush.bf16.msra.mxu1 %v1111_v33  ;;  %553 = vmatpush.bf16.msra.mxu2 %v1051_v34  ;;  %v1295_v51 = vld [vmem:[%s1825_s30 + $0xb4] sm:$0xf0]  ;;  %v1032_v53 = vld [vmem:[%s1825_s30 + $0x38] sm:$0xf0]  ;;  %v1294_v54 = vld [vmem:[%s1825_s30 + $0xb4] sm:$0xf]  ;;  %v1031_v56 = vor.u32 %v1279_v48, %v1030_v47 }
  0x51   : > { %567 = vmatpush.bf16.msra.mxu3 %v1115_v38  ;;  %v1096_v55 = vld [vmem:[%s1825_s30 + $0xb8] sm:$0xf0]  ;;  %v1095_v57 = vor.u32 %v1295_v51, %v1094_v49  ;;  %v1035_v58 = vor.u32 %v1278_v52, %v1032_v53  ;;  %v1022_v59 = vld [vmem:[%s1825_s30 + $0x20] sm:$0xf]  ;;  %v1277_v60 = vld [vmem:[%s1825_s30 + $0x24] sm:$0xf0] }
  0x52   : > { %v1086_v61 = vld [vmem:[%s1825_s30 + $0xa0] sm:$0xf]  ;;  %v1099_v62 = vor.u32 %v1294_v54, %v1096_v55  ;;  %v1293_v63 = vld [vmem:[%s1825_s30 + $0xa4] sm:$0xf0]  ;;  %v1276_v0 = vld [vmem:[%s1825_s30 + $0x24] sm:$0xf]  ;;  %v1023_v4 = vor.u32 %v1277_v60, %v1022_v59 }
  0x53   : > { %526 = vmatpush.bf16.msra.mxu0 %v1039_v44  ;;  %v1024_v1 = vld [vmem:[%s1825_s30 + $0x28] sm:$0xf0]  ;;  %v1292_v2 = vld [vmem:[%s1825_s30 + $0xa4] sm:$0xf]  ;;  %v1087_v5 = vor.u32 %v1293_v63, %v1086_v61  ;;  %v1014_v7 = vld [vmem:[%s1825_s30 + $0x10] sm:$0xf] }
  0x54   : > { %540 = vmatpush.bf16.msra.mxu1 %v1103_v45  ;;  %554 = vmatpush.bf16.msra.mxu2 %v1043_v46  ;;  %v1088_v3 = vld [vmem:[%s1825_s30 + $0xa8] sm:$0xf0]  ;;  %v1027_v6 = vor.u32 %v1276_v0, %v1024_v1  ;;  %v1275_v8 = vld [vmem:[%s1825_s30 + $0x14] sm:$0xf0]  ;;  %v1078_v9 = vld [vmem:[%s1825_s30 + $0x90] sm:$0xf] }
  0x55   : > { %568 = vmatpush.bf16.msra.mxu3 %v1107_v50  ;;  %v1091_v10 = vor.u32 %v1292_v2, %v1088_v3  ;;  %v1291_v11 = vld [vmem:[%s1825_s30 + $0x94] sm:$0xf0]  ;;  %v1274_v12 = vld [vmem:[%s1825_s30 + $0x14] sm:$0xf]  ;;  %v1016_v13 = vld [vmem:[%s1825_s30 + $0x18] sm:$0xf0]  ;;  %v1015_v16 = vor.u32 %v1275_v8, %v1014_v7 }
  0x56   : > { %v1290_v14 = vld [vmem:[%s1825_s30 + $0x94] sm:$0xf]  ;;  %v1080_v15 = vld [vmem:[%s1825_s30 + $0x98] sm:$0xf0]  ;;  %v1006_v17 = vld [vmem:[%s1825_s30] sm:$0xf]  ;;  %v1079_v19 = vor.u32 %v1291_v11, %v1078_v9  ;;  %v1019_v20 = vor.u32 %v1274_v12, %v1016_v13 }
  0x57   : > { %527 = vmatpush.bf16.msra.mxu0 %v1031_v56  ;;  %v1273_v18 = vld [vmem:[%s1825_s30 + $0x4] sm:$0xf0]  ;;  %v1070_v21 = vld [vmem:[%s1825_s30 + $0x80] sm:$0xf]  ;;  %v1272_v23 = vld [vmem:[%s1825_s30 + $0x4] sm:$0xf]  ;;  %v1083_v24 = vor.u32 %v1290_v14, %v1080_v15 }
  0x58   : > { %541 = vmatpush.bf16.msra.mxu1 %v1095_v57  ;;  %555 = vmatpush.bf16.msra.mxu2 %v1035_v58  ;;  %v1289_v22 = vld [vmem:[%s1825_s30 + $0x84] sm:$0xf0]  ;;  %v1008_v25 = vld [vmem:[%s1825_s30 + $0x8] sm:$0xf0]  ;;  %v1288_v26 = vld [vmem:[%s1825_s30 + $0x84] sm:$0xf]  ;;  %v1007_v31 = vor.u32 %v1273_v18, %v1006_v17 }
  0x59   : > { %569 = vmatpush.bf16.msra.mxu3 %v1099_v62  ;;  %v1072_v27 = vld [vmem:[%s1825_s30 + $0x88] sm:$0xf0]  ;;  %v998_v28 = vld [vmem:[%s1805_s20] sm:$0xf]  ;;  %v1320_v30 = vld [vmem:[%s1894_s29 + $0x74] sm:$0xf0]  ;;  %v1071_v35 = vor.u32 %v1289_v22, %v1070_v21  ;;  %v1011_v36 = vor.u32 %v1272_v23, %v1008_v25 }
  0x5a   : > { %v1191_v29 = vld [vmem:[%s1894_s29 + $0x70] sm:$0xf]  ;;  %v1270_v32 = vld [vmem:[%s1805_s20 + $0x4] sm:$0xf0]  ;;  %v1319_v33 = vld [vmem:[%s1894_s29 + $0x74] sm:$0xf]  ;;  %v1075_v39 = vor.u32 %v1288_v26, %v1072_v27 }
  0x5b   : > { %528 = vmatpush.bf16.msra.mxu0 %v1023_v4  ;;  %v1193_v34 = vld [vmem:[%s1894_s29 + $0x78] sm:$0xf0]  ;;  %v1269_v37 = vld [vmem:[%s1805_s20 + $0x4] sm:$0xf]  ;;  %v1192_v40 = vor.u32 %v1320_v30, %v1191_v29  ;;  %v1183_v41 = vld [vmem:[%s1894_s29 + $0x60] sm:$0xf]  ;;  %v999_v44 = vor.u32 %v1270_v32, %v998_v28 }
  0x5c   : > { %542 = vmatpush.bf16.msra.mxu1 %v1087_v5  ;;  %556 = vmatpush.bf16.msra.mxu2 %v1027_v6  ;;  %v1000_v38 = vld [vmem:[%s1805_s20 + $0x8] sm:$0xf0]  ;;  %v1255_v42 = vld [vmem:[%s1894_s29 + $0xf0] sm:$0xf]  ;;  %v1336_v43 = vld [vmem:[%s1894_s29 + $0xf4] sm:$0xf0]  ;;  %v1196_v45 = vor.u32 %v1319_v33, %v1193_v34 }
  0x5d   : > { %570 = vmatpush.bf16.msra.mxu3 %v1091_v10  ;;  %v1318_v46 = vld [vmem:[%s1894_s29 + $0x64] sm:$0xf0]  ;;  %v1335_v47 = vld [vmem:[%s1894_s29 + $0xf4] sm:$0xf]  ;;  %v1257_v48 = vld [vmem:[%s1894_s29 + $0xf8] sm:$0xf0]  ;;  %v1003_v49 = vor.u32 %v1269_v37, %v1000_v38  ;;  %v1256_v52 = vor.u32 %v1336_v43, %v1255_v42 }
  0x5e   : > { %v1317_v50 = vld [vmem:[%s1894_s29 + $0x64] sm:$0xf]  ;;  %v1185_v51 = vld [vmem:[%s1894_s29 + $0x68] sm:$0xf0]  ;;  %v1184_v53 = vor.u32 %v1318_v46, %v1183_v41  ;;  %v1260_v54 = vor.u32 %v1335_v47, %v1257_v48  ;;  %v1175_v55 = vld [vmem:[%s1894_s29 + $0x50] sm:$0xf] }
  0x5f   : > { %529 = vmatpush.bf16.msra.mxu0 %v1015_v16  ;;  %v1247_v56 = vld [vmem:[%s1894_s29 + $0xe0] sm:$0xf]  ;;  %v1334_v57 = vld [vmem:[%s1894_s29 + $0xe4] sm:$0xf0]  ;;  %v1188_v58 = vor.u32 %v1317_v50, %v1185_v51  ;;  %v1316_v59 = vld [vmem:[%s1894_s29 + $0x54] sm:$0xf0] }
  0x60   : > { %543 = vmatpush.bf16.msra.mxu1 %v1079_v19  ;;  %557 = vmatpush.bf16.msra.mxu2 %v1019_v20  ;;  %v1333_v60 = vld [vmem:[%s1894_s29 + $0xe4] sm:$0xf]  ;;  %v1249_v61 = vld [vmem:[%s1894_s29 + $0xe8] sm:$0xf0]  ;;  %v1315_v62 = vld [vmem:[%s1894_s29 + $0x54] sm:$0xf]  ;;  %v1248_v0 = vor.u32 %v1334_v57, %v1247_v56  ;;  %v1176_v1 = vor.u32 %v1316_v59, %v1175_v55 }
  0x61   : > { %571 = vmatpush.bf16.msra.mxu3 %v1083_v24  ;;  %v1177_v63 = vld [vmem:[%s1894_s29 + $0x58] sm:$0xf0]  ;;  %v1252_v2 = vor.u32 %v1333_v60, %v1249_v61  ;;  %v1167_v4 = vld [vmem:[%s1894_s29 + $0x40] sm:$0xf]  ;;  %v1314_v5 = vld [vmem:[%s1894_s29 + $0x44] sm:$0xf0] }
  0x62   : > { %v1180_v3 = vor.u32 %v1315_v62, %v1177_v63  ;;  %v1313_v6 = vld [vmem:[%s1894_s29 + $0x44] sm:$0xf]  ;;  %v1168_v7 = vor.u32 %v1314_v5, %v1167_v4  ;;  %v1169_v8 = vld [vmem:[%s1894_s29 + $0x48] sm:$0xf0]  ;;  %v1239_v10 = vld [vmem:[%s1894_s29 + $0xd0] sm:$0xf] }
  0x63   : > { %530 = vmatpush.bf16.msra.mxu0 %v1007_v31  ;;  %v1172_v9 = vor.u32 %v1313_v6, %v1169_v8  ;;  %v1332_v11 = vld [vmem:[%s1894_s29 + $0xd4] sm:$0xf0]  ;;  %v1331_v12 = vld [vmem:[%s1894_s29 + $0xd4] sm:$0xf]  ;;  %v1241_v14 = vld [vmem:[%s1894_s29 + $0xd8] sm:$0xf0] }
  0x64   : > { %544 = vmatpush.bf16.msra.mxu1 %v1071_v35  ;;  %558 = vmatpush.bf16.msra.mxu2 %v1011_v36  ;;  %v1240_v13 = vor.u32 %v1332_v11, %v1239_v10  ;;  %v1244_v15 = vor.u32 %v1331_v12, %v1241_v14  ;;  %v1159_v16 = vld [vmem:[%s1894_s29 + $0x30] sm:$0xf]  ;;  %v1312_v17 = vld [vmem:[%s1894_s29 + $0x34] sm:$0xf0]  ;;  %v1311_v18 = vld [vmem:[%s1894_s29 + $0x34] sm:$0xf] }
  0x65   : > { %572 = vmatpush.bf16.msra.mxu3 %v1075_v39  ;;  %v1160_v19 = vor.u32 %v1312_v17, %v1159_v16  ;;  %v1161_v20 = vld [vmem:[%s1894_s29 + $0x38] sm:$0xf0]  ;;  %v1231_v22 = vld [vmem:[%s1894_s29 + $0xc0] sm:$0xf]  ;;  %v1330_v23 = vld [vmem:[%s1894_s29 + $0xc4] sm:$0xf0] }
  0x66   : > { %531 = vmatmul.bf16.vlgmr.msra.gmra.mxu0 %v999_v44  ;;  %v1164_v21 = vor.u32 %v1311_v18, %v1161_v20  ;;  %v1329_v24 = vld [vmem:[%s1894_s29 + $0xc4] sm:$0xf]  ;;  %v1232_v25 = vor.u32 %v1330_v23, %v1231_v22  ;;  %v1233_v26 = vld [vmem:[%s1894_s29 + $0xc8] sm:$0xf0]  ;;  %v1151_v28 = vld [vmem:[%s1894_s29 + $0x20] sm:$0xf] }
  0x67   : > { %790 = vmatpush.bf16.msrb.mxu0 %v1192_v40  ;;  %545 = vmatmul.bf16.vlgmr.msra.gmra.mxu1 %v1003_v49  ;;  %v1236_v27 = vor.u32 %v1329_v24, %v1233_v26  ;;  %v1310_v29 = vld [vmem:[%s1894_s29 + $0x24] sm:$0xf0]  ;;  %v1309_v31 = vld [vmem:[%s1894_s29 + $0x24] sm:$0xf]  ;;  %v1153_v32 = vld [vmem:[%s1894_s29 + $0x28] sm:$0xf0] }
  0x68   : > { %818 = vmatpush.bf16.msrb.mxu2 %v1196_v45  ;;  %573 = vmatmul.bf16.vlgmr.msra.gmra.mxu3 %v1003_v49  ;;  %v1152_v30 = vor.u32 %v1310_v29, %v1151_v28  ;;  %v1156_v33 = vor.u32 %v1309_v31, %v1153_v32  ;;  %v1223_v34 = vld [vmem:[%s1894_s29 + $0xb0] sm:$0xf]  ;;  %v1328_v35 = vld [vmem:[%s1894_s29 + $0xb4] sm:$0xf0]  ;;  %v1327_v36 = vld [vmem:[%s1894_s29 + $0xb4] sm:$0xf] }
  0x69   : > { %559 = vmatmul.bf16.vlgmr.msra.gmra.mxu2 %v999_v44  ;;  %804 = vmatpush.bf16.msrb.mxu1 %v1256_v52  ;;  %v1224_v37 = vor.u32 %v1328_v35, %v1223_v34  ;;  %v1225_v38 = vld [vmem:[%s1894_s29 + $0xb8] sm:$0xf0]  ;;  %v1143_v40 = vld [vmem:[%s1894_s29 + $0x10] sm:$0xf]  ;;  %v1308_v41 = vld [vmem:[%s1894_s29 + $0x14] sm:$0xf0] }
  0x6a   : > { %832 = vmatpush.bf16.msrb.mxu3 %v1260_v54  ;;  %v1228_v39 = vor.u32 %v1327_v36, %v1225_v38  ;;  %v1307_v42 = vld [vmem:[%s1894_s29 + $0x14] sm:$0xf]  ;;  %v1144_v43 = vor.u32 %v1308_v41, %v1143_v40  ;;  %v1145_v44 = vld [vmem:[%s1894_s29 + $0x18] sm:$0xf0]  ;;  %v1215_v46 = vld [vmem:[%s1894_s29 + $0xa0] sm:$0xf] }
  0x6b   : > { %791 = vmatpush.bf16.msrb.mxu0 %v1184_v53  ;;  %v1148_v45 = vor.u32 %v1307_v42, %v1145_v44  ;;  %v1326_v47 = vld [vmem:[%s1894_s29 + $0xa4] sm:$0xf0]  ;;  %v1325_v48 = vld [vmem:[%s1894_s29 + $0xa4] sm:$0xf]  ;;  %v1217_v50 = vld [vmem:[%s1894_s29 + $0xa8] sm:$0xf0] }
  0x6c   : > { %819 = vmatpush.bf16.msrb.mxu2 %v1188_v58  ;;  %v1216_v49 = vor.u32 %v1326_v47, %v1215_v46  ;;  %v1220_v51 = vor.u32 %v1325_v48, %v1217_v50  ;;  %v1135_v52 = vld [vmem:[%s1894_s29] sm:$0xf]  ;;  %v1306_v53 = vld [vmem:[%s1894_s29 + $0x4] sm:$0xf0]  ;;  %v1305_v54 = vld [vmem:[%s1894_s29 + $0x4] sm:$0xf] }
  0x6d   : > { %805 = vmatpush.bf16.msrb.mxu1 %v1248_v0  ;;  %v1136_v55 = vor.u32 %v1306_v53, %v1135_v52  ;;  %v1137_v56 = vld [vmem:[%s1894_s29 + $0x8] sm:$0xf0]  ;;  %v1207_v58 = vld [vmem:[%s1894_s29 + $0x90] sm:$0xf]  ;;  %v1324_v59 = vld [vmem:[%s1894_s29 + $0x94] sm:$0xf0] }
  0x6e   : > { %833 = vmatpush.bf16.msrb.mxu3 %v1252_v2  ;;  %v1140_v57 = vor.u32 %v1305_v54, %v1137_v56  ;;  %v1323_v60 = vld [vmem:[%s1894_s29 + $0x94] sm:$0xf]  ;;  %v1208_v61 = vor.u32 %v1324_v59, %v1207_v58  ;;  %v1209_v62 = vld [vmem:[%s1894_s29 + $0x98] sm:$0xf0]  ;;  %v1199_v0 = vld [vmem:[%s1894_s29 + $0x80] sm:$0xf] }
  0x6f   : > { %792 = vmatpush.bf16.msrb.mxu0 %v1176_v1  ;;  %v1212_v63 = vor.u32 %v1323_v60, %v1209_v62  ;;  %v1322_v1 = vld [vmem:[%s1894_s29 + $0x84] sm:$0xf0]  ;;  %v1321_v2 = vld [vmem:[%s1894_s29 + $0x84] sm:$0xf]  ;;  %v1201_v4 = vld [vmem:[%s1894_s29 + $0x88] sm:$0xf0] }
  0x70   : > { %820 = vmatpush.bf16.msrb.mxu2 %v1180_v3  ;;  %v1200_v3 = vor.u32 %v1322_v1, %v1199_v0  ;;  %v1204_v5 = vor.u32 %v1321_v2, %v1201_v4  ;;  %s346_s10 = scalar_lea.vmem [#allocation9], %s995_s9  ;;  %v624_v35 = vld [vmem:[%s623_s21] sm:$0x3]  ;;  %s304_s20 = scalar_lea.vmem [#allocation12], %s988_s18 }
  0x71   : > { %806 = vmatpush.bf16.msrb.mxu1 %v1240_v13  ;;  %v347_v6 = vld [vmem:[%s346_s10] sm:$0x3]  ;;  %v626_v38 = vperm.slane %v624_v35, 0  ;;  %s864_s11 = sshll.u32 %s304_s20, 4  ;;  %s866_s19 = sshll.u32 %s863_s15, 4  ;;  %s865_s11 = int_to_ptr.vmem [resolvable:$true] %s864_s11  ;;  %s867_s19 = int_to_ptr.hbm [resolvable:$true] %s866_s19 }
  0x72   : > { %834 = vmatpush.bf16.msrb.mxu3 %v1244_v15  ;;  %v350_v11 = vperm.slane %v347_v6, 1  ;;  %s1569_s30 = sshra.s32 %s867_s19, 4  ;;  %s1575_s10 = scalar_lea.hbm %s2012_s6, 32  ;;  %s1570_s30 = int_to_ptr.hbm [resolvable:$true] %s1569_s30 }
  0x73   : > { %793 = vmatpush.bf16.msrb.mxu0 %v1168_v7  ;;  %v349_v7 = vperm.slane %v347_v6, 0  ;;  %s1571_s29 = scalar_lea.hbm %s1570_s30, 16  ;;  %p1576_p11 = scmp.lt.s32.totalorder %s1570_s30, %s2012_s6 }
  0x74   : > { %821 = vmatpush.bf16.msrb.mxu2 %v1172_v9  ;;  %p1572_p1 = scmp.ne.s32.totalorder %s1570_s30, %s1571_s29  ;;  %p1577_p9 = scmp.lt.s32.totalorder %s1575_s10, %s1571_s29 }
  0x75   : > { %807 = vmatpush.bf16.msrb.mxu1 %v1232_v25 }
  0x76   : > { %835 = vmatpush.bf16.msrb.mxu3 %v1236_v27  ;;  %p1573_p4 = pnand %p1572_p1, %p1769_p3  ;;  %p1578_p2 = por %p1577_p9, %p1576_p11 }
  0x77   : > { %794 = vmatpush.bf16.msrb.mxu0 %v1160_v19 }
  0x78   : > { %822 = vmatpush.bf16.msrb.mxu2 %v1164_v21  ;;  %p1574_p8 = pneg %p1573_p4 }
  0x79   : > { %808 = vmatpush.bf16.msrb.mxu1 %v1224_v37 }
  0x7a   : > { %836 = vmatpush.bf16.msrb.mxu3 %v1228_v39  ;;  %v627_v39 = vperm.slane %v624_v35, 1  ;;  %p1579_p10 = pnand %p1578_p2, %p1574_p8 }
  0x7b   : > { %795 = vmatpush.bf16.msrb.mxu0 %v1152_v30 }
  0x7c   : > { %823 = vmatpush.bf16.msrb.mxu2 %v1156_v33 }
  0x7d   : > { %809 = vmatpush.bf16.msrb.mxu1 %v1216_v49 }
  0x7e   : > { %837 = vmatpush.bf16.msrb.mxu3 %v1220_v51 }
  0x7f   : > { %796 = vmatpush.bf16.msrb.mxu0 %v1144_v43 }
  0x80   : > { %824 = vmatpush.bf16.msrb.mxu2 %v1148_v45 }
  0x81   : > { %810 = vmatpush.bf16.msrb.mxu1 %v1208_v61 }
  0x82   : > { %838 = vmatpush.bf16.msrb.mxu3 %v1212_v63 }
  0x83   : > { %797 = vmatpush.bf16.msrb.mxu0 %v1136_v55 }
  0x84   : > { %825 = vmatpush.bf16.msrb.mxu2 %v1140_v57 }
  0x85   : > { %811 = vmatpush.bf16.msrb.mxu1 %v1200_v3 }
  0x86   : > { %839 = vmatpush.bf16.msrb.mxu3 %v1204_v5 }
  0xe3   : > { %v532_v8 = vpop.f32.mrf.mxu0 }
  0xe4   : > { %v546_v9 = vpop.f32.mrf.mxu1  ;;  %v533_v10 = vadd.f32 %v532_v8, %v349_v7 }
  0xe6   : > { %v547_v12 = vadd.f32 %v546_v9, %v533_v10 }
  0xe8   : > { %v579_v19 = vmul.f32 0.01, %v547_v12 }
  0xea   : > { %v583_v23 = vmax.f32 %v547_v12, %v579_v19 }
  0xeb   : > { %v574_v14 = vpop.f32.mrf.mxu3  ;;  %v534_v15 = vpop.f32.mrf.mxu0 }
  0xec   : > { %v560_v13 = vpop.f32.mrf.mxu2  ;;  %v535_v16 = vadd.f32 %v534_v15, %v349_v7  ;;  %v548_v18 = vpop.f32.mrf.mxu1 }
  0xed   : > { %v561_v17 = vadd.f32 %v560_v13, %v350_v11 }
  0xee   : > { %v549_v20 = vadd.f32 %v548_v18, %v535_v16 }
  0xef   : > { %v575_v22 = vadd.f32 %v574_v14, %v561_v17 }
  0xf0   : > { %v581_v21 = vmul.f32 0.01, %v549_v20 }
  0xf1   : > { %v580_v29 = vmul.f32 0.01, %v575_v22 }
  0xf2   : > { %v585_v24 = vmax.f32 %v549_v20, %v581_v21 }
  0xf3   : > { %v576_v27 = vpop.f32.mrf.mxu3  ;;  %v584_v32 = vmax.f32 %v575_v22, %v580_v29 }
  0xf4   : > { %v562_v25 = vpop.f32.mrf.mxu2  ;;  %v587_v28 = vpack.c.bf16 %v585_v24, %v583_v23 }
  0xf5   : > { %v563_v26 = vadd.f32 %v562_v25, %v350_v11 }
  0xf6   : > { %798 = vmatmul.bf16.vlgmr.msrb.gmra.mxu0 %v587_v28  ;;  %826 = vmatmul.bf16.vlgmr.msrb.gmra.mxu2 %v587_v28 }
  0xf7   : > { %v577_v30 = vadd.f32 %v576_v27, %v563_v26 }
  0xf9   : > { %v582_v31 = vmul.f32 0.01, %v577_v30 }
  0xfb   : > { %v586_v33 = vmax.f32 %v577_v30, %v582_v31 }
  0xfd   : > { %v588_v34 = vpack.c.bf16 %v586_v33, %v584_v32 }
  0xff   : > { %812 = vmatmul.bf16.vlgmr.msrb.gmra.mxu1 %v588_v34  ;;  %840 = vmatmul.bf16.vlgmr.msrb.gmra.mxu3 %v588_v34 }
 0x173   : > { %v799_v36 = vpop.f32.mrf.mxu0 }
 0x174   : > { %v800_v41 = vadd.f32 %v799_v36, %v626_v38 }
 0x179   : > { %v827_v37 = vpop.f32.mrf.mxu2 }
 0x17a   : > { %v828_v42 = vadd.f32 %v827_v37, %v627_v39 }
 0x17b   : > { %v801_v47 = vpop.f32.mrf.mxu0 }
 0x17c   : > { %v813_v40 = vpop.f32.mrf.mxu1  ;;  %v802_v50 = vadd.f32 %v801_v47, %v626_v38 }
 0x17d   : > { %v814_v44 = vadd.f32 %v813_v40, %v800_v41 }
 0x181   : > { %v829_v48 = vpop.f32.mrf.mxu2 }
 0x182   : > { %v841_v43 = vpop.f32.mrf.mxu3  ;;  %v830_v51 = vadd.f32 %v829_v48, %v627_v39 }
 0x183   : > { %v842_v45 = vadd.f32 %v841_v43, %v828_v42 }
 0x184   : > { %v815_v49 = vpop.f32.mrf.mxu1 }
 0x185   : > { %v846_v46 = vpack.c.bf16 %v842_v45, %v814_v44  ;;  %v816_v53 = vadd.f32 %v815_v49, %v802_v50 }
 0x187   : > { %848 = vst [vmem:[%s304_s20] sm:$0xff] %v846_v46 }
 0x18a   : > { %v843_v52 = vpop.f32.mrf.mxu3 }
 0x18b   : > { %v844_v54 = vadd.f32 %v843_v52, %v830_v51 }
 0x18d   : > { %v847_v55 = vpack.c.bf16 %v844_v54, %v816_v53 }
 0x18f   : > { %849 = vst [vmem:[%s304_s20 + $0x8] sm:$0xff] %v847_v55 }
 0x190   : > { %1582 = shalt.err (!%p1579_p10)
}
 0x191   : > { %s1641_s8 = smov 128   ;;  %s1642_s21 = smov 8  }
 0x192   : > { %1353 = dma.vmem_to_hbm [thread:$0]  (%p1769_p3), %s865_s11, 256, %s867_s19, %s851_s0, %s1641_s8, %s1641_s8, %s1642_s21  }
 0x193 PF: > { %s881_s23 = sand.u32 1, %s1619_s25   ;;  %p2021_p12 = scmp.ge.s32.totalorder %s1631_s28, 2 }
 0x194   : > { %s882_s24 = scalar_lea.sflag [#allocation6], %s881_s23 }
 0x195   : > { %p1370_p13 = pnand %p2021_p12, %p1716_p6 }
 0x197   : > { %p1371_p0 = pneg %p1370_p13 }
 0x199   : > { %1614 = dma.done.wait (%p1371_p0), %s882_s24, 256  }
 0x19a   : > { %1616 = vsyncadd (%p1371_p0), %s882_s24, 4294967040  ;;  %p29_p5 = scmp.ge.s32.totalorder %s1756_s12, 4   ;;  %s2022_s25 = smov %s1623_s26 }
 0x19b   : > { %s2023_s26 = smov %s1627_s27  ;;  %s2024_s27 = smov %s1765_s16 }
 0x19c   : > { %s2025_s28 = smov %s1756_s12  ;;  %31 = sbr.rel (!%p29_p5) target bundleno = 13 (0xd), region = 101 }
 0x1a1   :  { %888 = vsyncpa [#allocation5], 1 }
 0x1a2   :  { %890 = vsyncpa [#allocation5 + $0x1], 1 }
 0x1a3   :  { %891 = vsyncpa [#allocation8], 1 }
 0x1a4   :  { %892 = vsyncpa [#allocation11], 1 }
 0x1a5   :  { %893 = vsyncpa [#allocation6], 1 }
 0x1a6   :  { %895 = vsyncpa [#allocation6 + $0x1], 1 }

</bundles_post_ra>
